<compile_context>
chip_gen: v5e
topology: v5e:2x2
jax: 0.10.0
libtpu: 0.0.40
codegen_flags: <defaults>
</compile_context>

<pallas_src>
import functools

import jax
import jax.numpy as jnp
from jax.experimental import pallas as pl
from jax.experimental.pallas import tpu as pltpu


def _dilated_conv(x, w, b, k, d, T, relu):
    """'same'-padded dilated Conv1d on a lane-dense, channels-first tile.

    x: (Cin, N) f32 with N = Bb*T, time fastest within each batch element.
    w: (Cout, k*Cin) where w[o, j*Cin + c] == torch_weight[o, c, j].
    b: (Cout, 1).
    Returns (Cout, N) f32.
    """
    cin, n = x.shape
    pad = (d * (k - 1)) // 2
    # Within-batch time index of every lane (batches are packed time-fastest).
    t_idx = jax.lax.broadcasted_iota(jnp.int32, (1, n), 1) % T

    taps = []
    for j in range(k):                       # static unroll over taps
        s = j * d - pad                      # out[:, t] consumes x[:, t + s]
        if s == 0:
            taps.append(x)
        else:
            # Lane roll brings x[:, p + s] to lane p; wrapped / cross-batch
            # lanes are exactly those with t + s outside [0, T) -> masked to 0.
            xs = jnp.roll(x, -s, axis=1)
            valid = (t_idx + s >= 0) & (t_idx + s < T)
            taps.append(jnp.where(valid, xs, 0.0))

    x_stack = taps[0] if k == 1 else jnp.concatenate(taps, axis=0)   # (k*Cin, N)
    acc = jnp.dot(w, x_stack, preferred_element_type=jnp.float32) + b
    if relu:
        acc = jnp.maximum(acc, 0.0)
    return acc


def _ft_kernel(x_ref, w1_ref, b1_ref, w2_ref, b2_ref, w3_ref, b3_ref, alpha_ref,
               o_ref, *, k1, d1, k2, d2, T):
    x = x_ref[...].astype(jnp.float32)                                     # (C, N)
    h1 = _dilated_conv(x, w1_ref[...], b1_ref[...], k1, d1, T, relu=True)  # (H, N)
    h2 = _dilated_conv(h1, w2_ref[...], b2_ref[...], k2, d2, T, relu=True) # (H, N)
    # Final 1x1 conv == plain matmul.
    nl = jnp.dot(w3_ref[...], h2, preferred_element_type=jnp.float32)
    nl = nl + b3_ref[...]                                                  # (C, N)
    alpha = alpha_ref[0, 0]                     # tanh(alpha), precomputed, in SMEM
    o_ref[...] = (alpha * nl + x).astype(o_ref.dtype)


def _pick_batch_chunk(B, T):
    """Batch elements per grid step.

    Blocks are (C, Bb*T); the lane extent must be a multiple of 128 or cover
    the full array, so pick the largest divisor of B with Bb*T % 128 == 0 and
    Bb*T <= 1024 lanes; otherwise fall back to the whole batch (always legal).
    """
    best = B
    for bb in range(1, B + 1):
        if B % bb == 0 and (bb * T) % 128 == 0 and bb * T <= 1024:
            best = bb
    return best


@functools.partial(jax.jit, static_argnames=("k1", "d1", "k2", "d2"))
def feature_transformer_forward(x, params, *, k1, d1, k2, d2):
    """Forward pass matching FeatureTransformer.forward (identity projection).

    x: (B, T, C) -> (B, T, C), same layout as the PyTorch module.
    """
    B, T, C = x.shape
    H = params["w1"].shape[2]
    if (d1 * (k1 - 1)) % 2 or (d2 * (k2 - 1)) % 2:
        # PyTorch padding=int(0.5*d*(k-1)) shortens the sequence when d*(k-1)
        # is odd; only the length-preserving (odd-kernel) case is implemented.
        raise NotImplementedError("dilation*(kernel_size-1) must be even")

    # Channels-first, lane-dense HBM layout: (C, B*T), time fastest per batch.
    x_cf = jnp.transpose(x, (2, 0, 1)).reshape(C, B * T)

    # Fold the k taps of each conv into a single matmul operand (trace time).
    w1 = params["w1"].reshape(k1 * C, H).T           # (H, k1*C)
    w2 = params["w2"].reshape(k2 * H, H).T           # (H, k2*H)
    w3 = params["w3"].T                              # (C, H)
    b1 = params["b1"].reshape(H, 1)
    b2 = params["b2"].reshape(H, 1)
    b3 = params["b3"].reshape(C, 1)
    alpha = jnp.tanh(params["alpha"]).reshape(1, 1)  # tanh once, outside kernel

    Bb = _pick_batch_chunk(B, T)
    n_lanes = Bb * T
    grid = (B // Bb,)

    kernel = functools.partial(_ft_kernel, k1=k1, d1=d1, k2=k2, d2=d2, T=T)
    flops = 2 * B * T * (k1 * C * H + k2 * H * H + H * C)
    bytes_accessed = 4 * (2 * B * T * C + k1 * C * H + k2 * H * H + H * C
                          + 2 * H + C + 1)

    out_cf = pl.pallas_call(
        kernel,
        out_shape=jax.ShapeDtypeStruct((C, B * T), x.dtype),
        grid=grid,
        in_specs=[
            pl.BlockSpec((C, n_lanes), lambda i: (0, i)),        # x (lane-dense)
            pl.BlockSpec((H, k1 * C), lambda i: (0, 0)),         # conv1 fused W
            pl.BlockSpec((H, 1), lambda i: (0, 0)),              # conv1 bias
            pl.BlockSpec((H, k2 * H), lambda i: (0, 0)),         # conv2 fused W
            pl.BlockSpec((H, 1), lambda i: (0, 0)),              # conv2 bias
            pl.BlockSpec((C, H), lambda i: (0, 0)),              # conv3 (1x1) W
            pl.BlockSpec((C, 1), lambda i: (0, 0)),              # conv3 bias
            pl.BlockSpec(memory_space=pltpu.MemorySpace.SMEM),   # tanh(alpha)
        ],
        out_specs=pl.BlockSpec((C, n_lanes), lambda i: (0, i)),
        compiler_params=pltpu.CompilerParams(
            dimension_semantics=("parallel",)),
        cost_estimate=pl.CostEstimate(flops=flops, transcendentals=0,
                                      bytes_accessed=bytes_accessed),
    )(x_cf, w1, b1, w2, b2, w3, b3, alpha)

    # Back to the module's (B, T, C) layout (wrapper-side layout plumbing).
    return out_cf.reshape(C, B, T).transpose(1, 2, 0)


def reference_forward(x, params, *, k1, d1, k2, d2):
    """Pure-JAX reference (same math as the PyTorch module, channels-last)."""
    def conv(inp, w, b, d):
        k, cin, cout = w.shape
        pad = (d * (k - 1)) // 2
        T = inp.shape[1]
        xp = jnp.pad(inp, ((0, 0), (pad, pad), (0, 0)))
        acc = jnp.zeros((inp.shape[0], T, cout), jnp.float32) + b
        for j in range(k):
            acc = acc + jnp.einsum("btc,cd->btd", xp[:, j * d : j * d + T, :], w[j])
        return acc

    h1 = jax.nn.relu(conv(x, params["w1"], params["b1"], d1))
    h2 = jax.nn.relu(conv(h1, params["w2"], params["b2"], d2))
    nl = jnp.einsum("bth,hc->btc", h2, params["w3"]) + params["b3"]
    alpha = jnp.tanh(params["alpha"][0, 0])
    return alpha * nl + x


def init_params(key, C, H, k1, k2, alpha_value=0.0):
    ks = jax.random.split(key, 6)
    scale = 0.1
    return {
        "w1": scale * jax.random.normal(ks[0], (k1, C, H), jnp.float32),
        "b1": scale * jax.random.normal(ks[1], (1, H), jnp.float32),
        "w2": scale * jax.random.normal(ks[2], (k2, H, H), jnp.float32),
        "b2": scale * jax.random.normal(ks[3], (1, H), jnp.float32),
        "w3": scale * jax.random.normal(ks[4], (H, C), jnp.float32),
        "b3": scale * jax.random.normal(ks[5], (1, C), jnp.float32),
        # nn.Parameter(torch.FloatTensor([0])) -> alpha initialized to 0
        "alpha": jnp.full((1, 1), alpha_value, jnp.float32),
    }


if __name__ == "__main__":
    config = dict(
        projection="identity",
        out_feature_dim=8,          # C
        network_hidden_unit=32,     # H
        kernel_size1=3, dilation1=1,
        kernel_size2=3, dilation2=2,
        learning_rate=1e-3,
    )
    B, T = 2, 16
    C, H = config["out_feature_dim"], config["network_hidden_unit"]
    k1, d1 = config["kernel_size1"], config["dilation1"]
    k2, d2 = config["kernel_size2"], config["dilation2"]

    key = jax.random.PRNGKey(0)
    kx, kp = jax.random.split(key)
    x = jax.random.normal(kx, (B, T, C), jnp.float32)

    # 1) Parameters exactly as at module __init__ time (alpha = 0).
    params0 = init_params(kp, C, H, k1, k2, alpha_value=0.0)
    out0 = jax.block_until_ready(
        feature_transformer_forward(x, params0, k1=k1, d1=d1, k2=k2, d2=d2))
    ref0 = reference_forward(x, params0, k1=k1, d1=d1, k2=k2, d2=d2)
    assert out0.shape == (B, T, C)
    assert jnp.allclose(out0, ref0, atol=1e-5), "mismatch at alpha=0"

    # 2) Nonzero alpha to exercise the full conv path end-to-end.
    params1 = init_params(kp, C, H, k1, k2, alpha_value=0.5)
    out1 = jax.block_until_ready(
        feature_transformer_forward(x, params1, k1=k1, d1=d1, k2=k2, d2=d2))
    ref1 = reference_forward(x, params1, k1=k1, d1=d1, k2=k2, d2=d2)
    assert jnp.allclose(out1, ref1, atol=1e-4), "mismatch at alpha=0.5"

    print("KERNEL_OK")
</pallas_src>

<mosaic_0001>
module attributes {stable_mosaic.version = 11 : i64} {
  func.func @_ft_kernel(%arg0: i32, %arg1: memref<8x32xf32, #tpu.memory_space<vmem>>, %arg2: memref<32x24xf32, #tpu.memory_space<vmem>>, %arg3: memref<32x1xf32, #tpu.memory_space<vmem>>, %arg4: memref<32x96xf32, #tpu.memory_space<vmem>>, %arg5: memref<32x1xf32, #tpu.memory_space<vmem>>, %arg6: memref<8x32xf32, #tpu.memory_space<vmem>>, %arg7: memref<8x1xf32, #tpu.memory_space<vmem>>, %arg8: memref<1x1xf32, #tpu.memory_space<smem>>, %arg9: memref<8x32xf32, #tpu.memory_space<vmem>>) attributes {dimension_semantics = [#tpu.dimension_semantics<parallel>], iteration_bounds = array<i64: 1>, scalar_prefetch = 0 : i64, scratch_operands = 0 : i64, tpu.core_type = #tpu.core_type<tc>, window_params = [{transform_indices = @transform_0, window_bounds = array<i64: 8, 32>}, {pipeline_mode = #tpu.pipeline_mode<synchronous>, transform_indices = @transform_1, window_bounds = array<i64: 32, 24>}, {pipeline_mode = #tpu.pipeline_mode<synchronous>, transform_indices = @transform_2, window_bounds = array<i64: 32, 1>}, {pipeline_mode = #tpu.pipeline_mode<synchronous>, transform_indices = @transform_3, window_bounds = array<i64: 32, 96>}, {pipeline_mode = #tpu.pipeline_mode<synchronous>, transform_indices = @transform_4, window_bounds = array<i64: 32, 1>}, {pipeline_mode = #tpu.pipeline_mode<synchronous>, transform_indices = @transform_5, window_bounds = array<i64: 8, 32>}, {pipeline_mode = #tpu.pipeline_mode<synchronous>, transform_indices = @transform_6, window_bounds = array<i64: 8, 1>}, {transform_indices = @transform_7, window_bounds = array<i64: 1, 1>}, {transform_indices = @transform_8, window_bounds = array<i64: 8, 32>}]} {
    %c0 = arith.constant 0 : index
    %c0_0 = arith.constant 0 : index
    %0 = vector.load %arg1[%c0, %c0_0] : memref<8x32xf32, #tpu.memory_space<vmem>>, vector<8x32xf32>
    %c0_1 = arith.constant 0 : index
    %c0_2 = arith.constant 0 : index
    %1 = vector.load %arg2[%c0_1, %c0_2] : memref<32x24xf32, #tpu.memory_space<vmem>>, vector<32x24xf32>
    %c0_3 = arith.constant 0 : index
    %c0_4 = arith.constant 0 : index
    %2 = vector.load %arg3[%c0_3, %c0_4] : memref<32x1xf32, #tpu.memory_space<vmem>>, vector<32x1xf32>
    %3 = tpu.iota {dimensions = array<i32: 1>} : vector<1x32xi32>
    %c16_i32 = arith.constant 16 : i32
    %c0_i32 = arith.constant 0 : i32
    %4 = arith.cmpi eq, %c16_i32, %c0_i32 : i32
    %c1_i32 = arith.constant 1 : i32
    %5 = arith.select %4, %c1_i32, %c16_i32 : i32
    %6 = vector.broadcast %5 : i32 to vector<1x32xi32>
    %7 = arith.remsi %3, %6 : vector<1x32xi32>
    %c0_i32_5 = arith.constant 0 : i32
    %8 = vector.broadcast %c0_i32_5 : i32 to vector<1x32xi32>
    %9 = arith.cmpi ne, %7, %8 : vector<1x32xi32>
    %c0_i32_6 = arith.constant 0 : i32
    %10 = vector.broadcast %c0_i32_6 : i32 to vector<1x32xi32>
    %11 = arith.cmpi slt, %7, %10 : vector<1x32xi32>
    %c0_i32_7 = arith.constant 0 : i32
    %12 = arith.cmpi slt, %5, %c0_i32_7 : i32
    %13 = vector.broadcast %12 : i1 to vector<1x32xi1>
    %14 = vector.broadcast %13 : vector<1x32xi1> to vector<1x32xi1>
    %15 = arith.xori %11, %14 : vector<1x32xi1>
    %16 = arith.andi %15, %9 : vector<1x32xi1>
    %17 = vector.broadcast %5 : i32 to vector<1x32xi32>
    %18 = arith.addi %7, %17 : vector<1x32xi32>
    %19 = arith.select %16, %18, %7 : vector<1x32xi1>, vector<1x32xi32>
    %20 = vector.extract_strided_slice %0 {offsets = [0, 31], sizes = [8, 1], strides = [1, 1]} : vector<8x32xf32> to vector<8x1xf32>
    %21 = vector.extract_strided_slice %0 {offsets = [0, 0], sizes = [8, 31], strides = [1, 1]} : vector<8x32xf32> to vector<8x31xf32>
    %22 = tpu.concatenate %20, %21 in 1 : vector<8x1xf32>, vector<8x31xf32> -> vector<8x32xf32>
    %c-1_i32 = arith.constant -1 : i32
    %23 = vector.broadcast %c-1_i32 : i32 to vector<1x32xi32>
    %24 = arith.addi %19, %23 : vector<1x32xi32>
    %c0_i32_8 = arith.constant 0 : i32
    %25 = vector.broadcast %c0_i32_8 : i32 to vector<1x32xi32>
    %26 = arith.cmpi sge, %24, %25 : vector<1x32xi32>
    %c-1_i32_9 = arith.constant -1 : i32
    %27 = vector.broadcast %c-1_i32_9 : i32 to vector<1x32xi32>
    %28 = arith.addi %19, %27 : vector<1x32xi32>
    %c16_i32_10 = arith.constant 16 : i32
    %29 = vector.broadcast %c16_i32_10 : i32 to vector<1x32xi32>
    %30 = arith.cmpi slt, %28, %29 : vector<1x32xi32>
    %31 = arith.andi %26, %30 : vector<1x32xi1>
    %cst = arith.constant 0.000000e+00 : f32
    %32 = vector.shape_cast %31 : vector<1x32xi1> to vector<1x32xi1>
    %33 = vector.broadcast %32 : vector<1x32xi1> to vector<8x32xi1>
    %34 = vector.broadcast %cst : f32 to vector<8x32xf32>
    %35 = arith.select %33, %22, %34 : vector<8x32xi1>, vector<8x32xf32>
    %36 = vector.extract_strided_slice %0 {offsets = [0, 1], sizes = [8, 31], strides = [1, 1]} : vector<8x32xf32> to vector<8x31xf32>
    %37 = vector.extract_strided_slice %0 {offsets = [0, 0], sizes = [8, 1], strides = [1, 1]} : vector<8x32xf32> to vector<8x1xf32>
    %38 = tpu.concatenate %36, %37 in 1 : vector<8x31xf32>, vector<8x1xf32> -> vector<8x32xf32>
    %c1_i32_11 = arith.constant 1 : i32
    %39 = vector.broadcast %c1_i32_11 : i32 to vector<1x32xi32>
    %40 = arith.addi %19, %39 : vector<1x32xi32>
    %c0_i32_12 = arith.constant 0 : i32
    %41 = vector.broadcast %c0_i32_12 : i32 to vector<1x32xi32>
    %42 = arith.cmpi sge, %40, %41 : vector<1x32xi32>
    %c1_i32_13 = arith.constant 1 : i32
    %43 = vector.broadcast %c1_i32_13 : i32 to vector<1x32xi32>
    %44 = arith.addi %19, %43 : vector<1x32xi32>
    %c16_i32_14 = arith.constant 16 : i32
    %45 = vector.broadcast %c16_i32_14 : i32 to vector<1x32xi32>
    %46 = arith.cmpi slt, %44, %45 : vector<1x32xi32>
    %47 = arith.andi %42, %46 : vector<1x32xi1>
    %cst_15 = arith.constant 0.000000e+00 : f32
    %48 = vector.shape_cast %47 : vector<1x32xi1> to vector<1x32xi1>
    %49 = vector.broadcast %48 : vector<1x32xi1> to vector<8x32xi1>
    %50 = vector.broadcast %cst_15 : f32 to vector<8x32xf32>
    %51 = arith.select %49, %38, %50 : vector<8x32xi1>, vector<8x32xf32>
    %52 = tpu.concatenate %35, %0, %51 in 0 : vector<8x32xf32>, vector<8x32xf32>, vector<8x32xf32> -> vector<24x32xf32>
    %cst_16 = arith.constant dense<0.000000e+00> : vector<32x32xf32>
    %53 = tpu.matmul %1, %52, %cst_16 {dimension_numbers = #tpu.dot_dimension_numbers<[1], [0], [0], [1], [0, 0, 1, 1], [], []>} : vector<32x24xf32>, vector<24x32xf32>, vector<32x32xf32> -> vector<32x32xf32>
    %54 = vector.broadcast %2 : vector<32x1xf32> to vector<32x32xf32>
    %55 = arith.addf %53, %54 : vector<32x32xf32>
    %cst_17 = arith.constant 0.000000e+00 : f32
    %56 = vector.broadcast %cst_17 : f32 to vector<32x32xf32>
    %57 = arith.maximumf %55, %56 : vector<32x32xf32>
    %c0_18 = arith.constant 0 : index
    %c0_19 = arith.constant 0 : index
    %58 = vector.load %arg4[%c0_18, %c0_19] : memref<32x96xf32, #tpu.memory_space<vmem>>, vector<32x96xf32>
    %c0_20 = arith.constant 0 : index
    %c0_21 = arith.constant 0 : index
    %59 = vector.load %arg5[%c0_20, %c0_21] : memref<32x1xf32, #tpu.memory_space<vmem>>, vector<32x1xf32>
    %60 = tpu.iota {dimensions = array<i32: 1>} : vector<1x32xi32>
    %c16_i32_22 = arith.constant 16 : i32
    %c0_i32_23 = arith.constant 0 : i32
    %61 = arith.cmpi eq, %c16_i32_22, %c0_i32_23 : i32
    %c1_i32_24 = arith.constant 1 : i32
    %62 = arith.select %61, %c1_i32_24, %c16_i32_22 : i32
    %63 = vector.broadcast %62 : i32 to vector<1x32xi32>
    %64 = arith.remsi %60, %63 : vector<1x32xi32>
    %c0_i32_25 = arith.constant 0 : i32
    %65 = vector.broadcast %c0_i32_25 : i32 to vector<1x32xi32>
    %66 = arith.cmpi ne, %64, %65 : vector<1x32xi32>
    %c0_i32_26 = arith.constant 0 : i32
    %67 = vector.broadcast %c0_i32_26 : i32 to vector<1x32xi32>
    %68 = arith.cmpi slt, %64, %67 : vector<1x32xi32>
    %c0_i32_27 = arith.constant 0 : i32
    %69 = arith.cmpi slt, %62, %c0_i32_27 : i32
    %70 = vector.broadcast %69 : i1 to vector<1x32xi1>
    %71 = vector.broadcast %70 : vector<1x32xi1> to vector<1x32xi1>
    %72 = arith.xori %68, %71 : vector<1x32xi1>
    %73 = arith.andi %72, %66 : vector<1x32xi1>
    %74 = vector.broadcast %62 : i32 to vector<1x32xi32>
    %75 = arith.addi %64, %74 : vector<1x32xi32>
    %76 = arith.select %73, %75, %64 : vector<1x32xi1>, vector<1x32xi32>
    %77 = vector.extract_strided_slice %57 {offsets = [0, 30], sizes = [32, 2], strides = [1, 1]} : vector<32x32xf32> to vector<32x2xf32>
    %78 = vector.extract_strided_slice %57 {offsets = [0, 0], sizes = [32, 30], strides = [1, 1]} : vector<32x32xf32> to vector<32x30xf32>
    %79 = tpu.concatenate %77, %78 in 1 : vector<32x2xf32>, vector<32x30xf32> -> vector<32x32xf32>
    %c-2_i32 = arith.constant -2 : i32
    %80 = vector.broadcast %c-2_i32 : i32 to vector<1x32xi32>
    %81 = arith.addi %76, %80 : vector<1x32xi32>
    %c0_i32_28 = arith.constant 0 : i32
    %82 = vector.broadcast %c0_i32_28 : i32 to vector<1x32xi32>
    %83 = arith.cmpi sge, %81, %82 : vector<1x32xi32>
    %c-2_i32_29 = arith.constant -2 : i32
    %84 = vector.broadcast %c-2_i32_29 : i32 to vector<1x32xi32>
    %85 = arith.addi %76, %84 : vector<1x32xi32>
    %c16_i32_30 = arith.constant 16 : i32
    %86 = vector.broadcast %c16_i32_30 : i32 to vector<1x32xi32>
    %87 = arith.cmpi slt, %85, %86 : vector<1x32xi32>
    %88 = arith.andi %83, %87 : vector<1x32xi1>
    %cst_31 = arith.constant 0.000000e+00 : f32
    %89 = vector.shape_cast %88 : vector<1x32xi1> to vector<1x32xi1>
    %90 = vector.broadcast %89 : vector<1x32xi1> to vector<32x32xi1>
    %91 = vector.broadcast %cst_31 : f32 to vector<32x32xf32>
    %92 = arith.select %90, %79, %91 : vector<32x32xi1>, vector<32x32xf32>
    %93 = vector.extract_strided_slice %57 {offsets = [0, 2], sizes = [32, 30], strides = [1, 1]} : vector<32x32xf32> to vector<32x30xf32>
    %94 = vector.extract_strided_slice %57 {offsets = [0, 0], sizes = [32, 2], strides = [1, 1]} : vector<32x32xf32> to vector<32x2xf32>
    %95 = tpu.concatenate %93, %94 in 1 : vector<32x30xf32>, vector<32x2xf32> -> vector<32x32xf32>
    %c2_i32 = arith.constant 2 : i32
    %96 = vector.broadcast %c2_i32 : i32 to vector<1x32xi32>
    %97 = arith.addi %76, %96 : vector<1x32xi32>
    %c0_i32_32 = arith.constant 0 : i32
    %98 = vector.broadcast %c0_i32_32 : i32 to vector<1x32xi32>
    %99 = arith.cmpi sge, %97, %98 : vector<1x32xi32>
    %c2_i32_33 = arith.constant 2 : i32
    %100 = vector.broadcast %c2_i32_33 : i32 to vector<1x32xi32>
    %101 = arith.addi %76, %100 : vector<1x32xi32>
    %c16_i32_34 = arith.constant 16 : i32
    %102 = vector.broadcast %c16_i32_34 : i32 to vector<1x32xi32>
    %103 = arith.cmpi slt, %101, %102 : vector<1x32xi32>
    %104 = arith.andi %99, %103 : vector<1x32xi1>
    %cst_35 = arith.constant 0.000000e+00 : f32
    %105 = vector.shape_cast %104 : vector<1x32xi1> to vector<1x32xi1>
    %106 = vector.broadcast %105 : vector<1x32xi1> to vector<32x32xi1>
    %107 = vector.broadcast %cst_35 : f32 to vector<32x32xf32>
    %108 = arith.select %106, %95, %107 : vector<32x32xi1>, vector<32x32xf32>
    %109 = tpu.concatenate %92, %57, %108 in 0 : vector<32x32xf32>, vector<32x32xf32>, vector<32x32xf32> -> vector<96x32xf32>
    %cst_36 = arith.constant dense<0.000000e+00> : vector<32x32xf32>
    %110 = tpu.matmul %58, %109, %cst_36 {dimension_numbers = #tpu.dot_dimension_numbers<[1], [0], [0], [1], [0, 0, 1, 1], [], []>} : vector<32x96xf32>, vector<96x32xf32>, vector<32x32xf32> -> vector<32x32xf32>
    %111 = vector.broadcast %59 : vector<32x1xf32> to vector<32x32xf32>
    %112 = arith.addf %110, %111 : vector<32x32xf32>
    %cst_37 = arith.constant 0.000000e+00 : f32
    %113 = vector.broadcast %cst_37 : f32 to vector<32x32xf32>
    %114 = arith.maximumf %112, %113 : vector<32x32xf32>
    %c0_38 = arith.constant 0 : index
    %c0_39 = arith.constant 0 : index
    %115 = vector.load %arg6[%c0_38, %c0_39] : memref<8x32xf32, #tpu.memory_space<vmem>>, vector<8x32xf32>
    %cst_40 = arith.constant dense<0.000000e+00> : vector<8x32xf32>
    %116 = tpu.matmul %115, %114, %cst_40 {dimension_numbers = #tpu.dot_dimension_numbers<[1], [0], [0], [1], [0, 0, 1, 1], [], []>} : vector<8x32xf32>, vector<32x32xf32>, vector<8x32xf32> -> vector<8x32xf32>
    %c0_41 = arith.constant 0 : index
    %c0_42 = arith.constant 0 : index
    %117 = vector.load %arg7[%c0_41, %c0_42] : memref<8x1xf32, #tpu.memory_space<vmem>>, vector<8x1xf32>
    %118 = vector.broadcast %117 : vector<8x1xf32> to vector<8x32xf32>
    %119 = arith.addf %116, %118 : vector<8x32xf32>
    %c0_43 = arith.constant 0 : index
    %c0_44 = arith.constant 0 : index
    %120 = memref.load %arg8[%c0_43, %c0_44] : memref<1x1xf32, #tpu.memory_space<smem>>
    %121 = vector.broadcast %120 : f32 to vector<8x32xf32>
    %122 = arith.mulf %121, %119 : vector<8x32xf32>
    %123 = arith.addf %122, %0 : vector<8x32xf32>
    %c0_45 = arith.constant 0 : index
    %c0_46 = arith.constant 0 : index
    %124 = vector.load %arg9[%c0_45, %c0_46] : memref<8x32xf32, #tpu.memory_space<vmem>>, vector<8x32xf32>
    tpu.vector_store %arg9[%c0_45, %c0_46], %123 {strides = array<i32>} : memref<8x32xf32, #tpu.memory_space<vmem>>, vector<8x32xf32>,
    return
  }
  func.func @transform_0(%arg0: i32) -> (i32, i32) {
    %c0_i32 = arith.constant 0 : i32
    %c0_i32_0 = arith.constant 0 : i32
    return %c0_i32, %arg0 : i32, i32
  }
  func.func @transform_1(%arg0: i32) -> (i32, i32) {
    %c0_i32 = arith.constant 0 : i32
    %c0_i32_0 = arith.constant 0 : i32
    %c0_i32_1 = arith.constant 0 : i32
    return %c0_i32, %c0_i32_0 : i32, i32
  }
  func.func @transform_2(%arg0: i32) -> (i32, i32) {
    %c0_i32 = arith.constant 0 : i32
    %c0_i32_0 = arith.constant 0 : i32
    %c0_i32_1 = arith.constant 0 : i32
    return %c0_i32, %c0_i32_0 : i32, i32
  }
  func.func @transform_3(%arg0: i32) -> (i32, i32) {
    %c0_i32 = arith.constant 0 : i32
    %c0_i32_0 = arith.constant 0 : i32
    %c0_i32_1 = arith.constant 0 : i32
    return %c0_i32, %c0_i32_0 : i32, i32
  }
  func.func @transform_4(%arg0: i32) -> (i32, i32) {
    %c0_i32 = arith.constant 0 : i32
    %c0_i32_0 = arith.constant 0 : i32
    %c0_i32_1 = arith.constant 0 : i32
    return %c0_i32, %c0_i32_0 : i32, i32
  }
  func.func @transform_5(%arg0: i32) -> (i32, i32) {
    %c0_i32 = arith.constant 0 : i32
    %c0_i32_0 = arith.constant 0 : i32
    %c0_i32_1 = arith.constant 0 : i32
    return %c0_i32, %c0_i32_0 : i32, i32
  }
  func.func @transform_6(%arg0: i32) -> (i32, i32) {
    %c0_i32 = arith.constant 0 : i32
    %c0_i32_0 = arith.constant 0 : i32
    %c0_i32_1 = arith.constant 0 : i32
    return %c0_i32, %c0_i32_0 : i32, i32
  }
  func.func @transform_7(%arg0: i32) -> (i32, i32) {
    %c0_i32 = arith.constant 0 : i32
    %c0_i32_0 = arith.constant 0 : i32
    %c0_i32_1 = arith.constant 0 : i32
    return %c0_i32, %c0_i32_0 : i32, i32
  }
  func.func @transform_8(%arg0: i32) -> (i32, i32) {
    %c0_i32 = arith.constant 0 : i32
    %c0_i32_0 = arith.constant 0 : i32
    return %c0_i32, %arg0 : i32, i32
  }
}

</mosaic_0001>

<bundles_post_ra>
// kernel: feature_transformer_forward.1
= control target key start
LH: loop header
LB: loop body
LE: loop exit
PB: predicated region body
PF: predicated region fallthrough
CT: control target
= control target key end

     0   :  { %s389_s29 = smov 97   ;;  %s390_s30 = smov 127   ;;  %v39_v1 = vlaneseq  ;;  %v393_v3 = vmov 0   ;;  %vm75_vm0 = vcmask 252928   ;;  %vm60_vm2 = vcmask 7168   ;;  %s556_s0 = inlined_call_operand.vmem [shape: f32[8,32], index: 0, kind: input, shape index: {}]   ;;  %s557_s2 = inlined_call_operand.vmem [shape: f32[32,1], index: 2, kind: input, shape index: {}]   ;;  %s558_s1 = inlined_call_operand.vmem [shape: f32[32,24], index: 1, kind: input, shape index: {}]   ;;  %s559_s4 = inlined_call_operand.vmem [shape: f32[32,1], index: 4, kind: input, shape index: {}]   ;;  %s560_s6 = inlined_call_operand.vmem [shape: f32[8,1], index: 6, kind: input, shape index: {}]   ;;  %s561_s3 = inlined_call_operand.vmem [shape: f32[32,96], index: 3, kind: input, shape index: {}]   ;;  %s562_s5 = inlined_call_operand.vmem [shape: f32[8,32], index: 5, kind: input, shape index: {}]   ;;  %s563_s7 = inlined_call_operand.<no memory space> [shape: f32[1,1], index: 7, kind: input, shape index: {}]   ;;  %s564_s8 = inlined_call_operand.vmem [shape: f32[8,32], index: 8, kind: output, shape index: {}]  }
   0x1   :  { %v446_v0 = vld [vmem:[%s556_s0] sm:$0xff]  ;;  %s391_s9 = smov 1   ;;  %s392_s10 = smov 31   ;;  %388 = vset.pattern.permute.xlu1 %v393_v3  ;;  %387 = vset.pattern.permute.xlu0 %v393_v3  ;;  %v36_v6 = vld [vmem:[%s557_s2 + $0x8] sm:$0xff]  ;;  %v38_v11 = vld [vmem:[%s557_s2 + $0x18] sm:$0xff]  ;;  %vm104_vm4 = vcmask 195584  }
   0x2   :  { %54 = vrot.lane.b32.xlu1 %v446_v0, %s389_s29  ;;  %69 = vrot.lane.b32.xlu0 %v446_v0, %s390_s30  ;;  %v35_v2 = vld [vmem:[%s557_s2] sm:$0xff]  ;;  %v40_v4 = vand.u32 127, %v39_v1  ;;  %v37_v17 = vld [vmem:[%s557_s2 + $0x10] sm:$0xff]  ;;  %s394_s2 = smov 126   ;;  %s395_s26 = smov 30   ;;  %vm225_vm6 = vcmask 244736  }
   0x3   :  { %386 = vset.pattern.permute.xlu2 %v393_v3  ;;  %v31_v15 = vld [vmem:[%s558_s1] sm:$0xff]  ;;  %v32_v18 = vld [vmem:[%s558_s1 + $0x8] sm:$0xff]  ;;  %v33_v19 = vld [vmem:[%s558_s1 + $0x10] sm:$0xff]  ;;  %s397_s27 = smov 2   ;;  %vm186_vm7 = vcmask 15360   ;;  %vm260_vm9 = vcmask 785408  }
   0x4   :  { %v455_v5 = vand.u32 15, %v40_v4  ;;  %101 = vperm.xlu2 %386, %v38_v11   ;;  %v34_v20 = vld [vmem:[%s558_s1 + $0x18] sm:$0xff]  ;;  %s396_s1 = smov 98   ;;  %v155_v37 = vld [vmem:[%s559_s4 + $0x8] sm:$0xff]  ;;  %v156_v38 = vld [vmem:[%s559_s4 + $0x10] sm:$0xff]  ;;  %vm313_vm10 = vcmask 261120  }
   0x5   :  { %v157_v39 = vld [vmem:[%s559_s4 + $0x18] sm:$0xff]  ;;  %v307_v40 = vld [vmem:[%s560_s6] sm:$0xff] }
   0x6   :  { %v77_v9 = vadd.s32 1, %v455_v5  ;;  %v62_v10 = vadd.s32 4294967295, %v455_v5  ;;  %v154_v41 = vld [vmem:[%s559_s4] sm:$0xff]  ;;  %v230_v47 = vadd.s32 2, %v455_v5  ;;  %v191_v57 = vadd.s32 4294967294, %v455_v5  ;;  %v152_v5 = vld [vmem:[%s561_s3 + $0x10] sm:$0xff] }
   0x7   :  { %v150_v4 = vld [vmem:[%s561_s3] sm:$0xff] }
   0x8   :  { %vm79_vm1 = vcmp.lt.s32.totalorder %v77_v9, 16  ;;  %vm63_vm3 = vcmp.ge.s32.totalorder %v62_v10, 0  ;;  %vm232_vm5 = vcmp.lt.s32.totalorder %v230_v47, 16  ;;  %vm192_vm8 = vcmp.ge.s32.totalorder %v191_v57, 0 }
   0xa   :  { %57 = vrot.lane.b32.xlu1 %v446_v0, %s391_s9  ;;  %72 = vrot.lane.b32.xlu0 %v446_v0, %s392_s10 }
   0xc   :  { %96 = vperm.xlu2 %386, %v37_v17  }
  0x12   :  { %86 = vperm.xlu1 %388, %v35_v2   ;;  %91 = vperm.xlu0 %387, %v36_v6  }
  0x5e   :  { %v102_v25 = vpop.permute.xlu2 %101 }
  0x66   :  { %v97_v30 = vpop.permute.xlu2 %96 }
  0x74   :  { %v55_v7 = vpop.permute.xlu1 %54  ;;  %v70_v8 = vpop.permute.xlu0 %69 }
  0x7c   :  { %v73_v12 = vpop.permute.xlu0 %72  ;;  %v58_v14 = vpop.permute.xlu1 %57 }
  0x7d   :  { %v76_v13 = vsel %vm75_vm0, %v70_v8, %v73_v12  ;;  %v61_v16 = vsel %vm60_vm2, %v55_v7, %v58_v14  ;;  %v151_v7 = vld [vmem:[%s561_s3 + $0x8] sm:$0xff]  ;;  %v153_v8 = vld [vmem:[%s561_s3 + $0x18] sm:$0xff] }
  0x7e   :  { %346 = vmatpush.msk.msra.mxu0 %vm79_vm1, %v76_v13 }
  0x80   :  { %131 = vmatpush.msra.mxu0 %v446_v0 }
  0x82   :  { %347 = vmatpush.msk.msra.mxu0 %vm63_vm3, %v61_v16 }
  0x83   :  { %348 = vmatmul.msk.f32.vlgmr.msra.gmra.mxu0 %vm104_vm4, %v31_v15 }
  0x84   :  { %v87_v21 = vpop.permute.xlu1 %86  ;;  %v92_v26 = vpop.permute.xlu0 %91 }
  0x8b   :  { %349 = vmatmul.msk.f32.gmra.mxu0 %vm104_vm4, %v32_v18 }
  0x93   :  { %350 = vmatmul.msk.f32.gmra.mxu0 %vm104_vm4, %v33_v19 }
  0x9b   :  { %351 = vmatmul.msk.f32.gmra.mxu0 %vm104_vm4, %v34_v20 }
 0x100   :  { %v134_v22 = vpop.f32.mrf.mxu0 }
 0x101   :  { %v135_v23 = vadd.f32 %v134_v22, %v87_v21 }
 0x103   :  { %v481_v24 = vmax.f32 %v135_v23, 0.0 }
 0x105   :  { %201 = vrot.lane.b32.xlu0 %v481_v24, %s394_s2 }
 0x108   :  { %v137_v27 = vpop.f32.mrf.mxu0 }
 0x109   :  { %v138_v28 = vadd.f32 %v137_v27, %v92_v26 }
 0x10b   :  { %v484_v29 = vmax.f32 %v138_v28, 0.0  ;;  %v338_v28 = vstv %s563_s7 }
 0x10d   :  { %215 = vrot.lane.b32.xlu2 %v484_v29, %s395_s26  ;;  %203 = vrot.lane.b32.xlu1 %v484_v29, %s394_s2 }
 0x110   :  { %v140_v31 = vpop.f32.mrf.mxu0 }
 0x111   :  { %v141_v32 = vadd.f32 %v140_v31, %v97_v30 }
 0x113   :  { %v148_v33 = vmax.f32 %v141_v32, 0.0 }
 0x115   :  { %217 = vrot.lane.b32.xlu0 %v148_v33, %s395_s26  ;;  %205 = vrot.lane.b32.xlu2 %v148_v33, %s394_s2 }
 0x118   :  { %v143_v34 = vpop.f32.mrf.mxu0 }
 0x119   :  { %v144_v35 = vadd.f32 %v143_v34, %v102_v25  ;;  %v306_v25 = vld [vmem:[%s562_s5] sm:$0xff] }
 0x11b   :  { %v149_v36 = vmax.f32 %v144_v35, 0.0 }
 0x11d   :  { %164 = vrot.lane.b32.xlu0 %v484_v29, %s396_s1  ;;  %207 = vrot.lane.b32.xlu2 %v149_v36, %s394_s2 }
 0x11e   :  { %219 = vrot.lane.b32.xlu1 %v149_v36, %s395_s26 }
 0x125   :  { %180 = vrot.lane.b32.xlu0 %v149_v36, %s397_s27  ;;  %178 = vrot.lane.b32.xlu2 %v148_v33, %s397_s27 }
 0x126   :  { %213 = vrot.lane.b32.xlu1 %v481_v24, %s395_s26 }
 0x12d   :  { %174 = vrot.lane.b32.xlu0 %v481_v24, %s397_s27  ;;  %168 = vrot.lane.b32.xlu2 %v149_v36, %s396_s1 }
 0x12e   :  { %166 = vrot.lane.b32.xlu1 %v148_v33, %s396_s1 }
 0x135   :  { %247 = vperm.xlu0 %387, %v155_v37   ;;  %162 = vrot.lane.b32.xlu2 %v481_v24, %s396_s1 }
 0x136   :  { %176 = vrot.lane.b32.xlu1 %v484_v29, %s397_s27 }
 0x13d   :  { %252 = vperm.xlu2 %386, %v156_v38  }
 0x13e   :  { %257 = vperm.xlu1 %388, %v157_v39  }
 0x145   :  { %310 = vperm.xlu2 %386, %v307_v40  }
 0x146   :  { %242 = vperm.xlu1 %388, %v154_v41  }
 0x167   :  { %v216_v42 = vpop.permute.xlu2 %215 }
 0x16f   :  { %v206_v43 = vpop.permute.xlu2 %205 }
 0x177   :  { %v202_v44 = vpop.permute.xlu0 %201  ;;  %v208_v48 = vpop.permute.xlu2 %207 }
 0x17f   :  { %v204_v45 = vpop.permute.xlu1 %203  ;;  %v179_v54 = vpop.permute.xlu2 %178 }
 0x180   :  { %v227_v53 = vsel %vm225_vm6, %v204_v45, %v216_v42 }
 0x187   :  { %v218_v46 = vpop.permute.xlu0 %217  ;;  %v169_v59 = vpop.permute.xlu2 %168 }
 0x188   :  { %v228_v51 = vsel %vm225_vm6, %v206_v43, %v218_v46 }
 0x18f   :  { %v165_v52 = vpop.permute.xlu0 %164  ;;  %v163_v3 = vpop.permute.xlu2 %162 }
 0x190   :  { %v220_v49 = vpop.permute.xlu1 %219 }
 0x191   :  { %v229_v50 = vsel %vm225_vm6, %v208_v48, %v220_v49 }
 0x192   :  { %352 = vmatpush.msk.msra.mxu1 %vm232_vm5, %v229_v50  ;;  %365 = vmatpush.msk.msra.mxu3 %vm232_vm5, %v229_v50 }
 0x194   :  { %353 = vmatpush.msk.msra.mxu1 %vm232_vm5, %v228_v51  ;;  %366 = vmatpush.msk.msra.mxu3 %vm232_vm5, %v228_v51 }
 0x196   :  { %354 = vmatpush.msk.msra.mxu1 %vm232_vm5, %v227_v53  ;;  %367 = vmatpush.msk.msra.mxu3 %vm232_vm5, %v227_v53 }
 0x197   :  { %v181_v58 = vpop.permute.xlu0 %180  ;;  %v253_v12 = vpop.permute.xlu2 %252 }
 0x198   :  { %v214_v55 = vpop.permute.xlu1 %213  ;;  %v190_v61 = vsel %vm186_vm7, %v169_v59, %v181_v58 }
 0x199   :  { %v226_v56 = vsel %vm225_vm6, %v202_v44, %v214_v55 }
 0x19a   :  { %355 = vmatpush.msk.msra.mxu1 %vm232_vm5, %v226_v56  ;;  %368 = vmatpush.msk.msra.mxu3 %vm232_vm5, %v226_v56 }
 0x19c   :  { %281 = vmatpush.msra.mxu1 %v149_v36  ;;  %369 = vmatpush.msra.mxu3 %v149_v36 }
 0x19e   :  { %282 = vmatpush.msra.mxu1 %v148_v33  ;;  %370 = vmatpush.msra.mxu3 %v148_v33 }
 0x19f   :  { %v175_v63 = vpop.permute.xlu0 %174  ;;  %v311_v26 = vpop.permute.xlu2 %310 }
 0x1a0   :  { %v167_v60 = vpop.permute.xlu1 %166  ;;  %283 = vmatpush.msra.mxu1 %v484_v29  ;;  %371 = vmatpush.msra.mxu3 %v484_v29  ;;  %v187_v6 = vsel %vm186_vm7, %v163_v3, %v175_v63 }
 0x1a1   :  { %v189_v62 = vsel %vm186_vm7, %v167_v60, %v179_v54 }
 0x1a2   :  { %284 = vmatpush.msra.mxu1 %v481_v24  ;;  %372 = vmatpush.msra.mxu3 %v481_v24 }
 0x1a4   :  { %356 = vmatpush.msk.msra.mxu1 %vm192_vm8, %v190_v61  ;;  %373 = vmatpush.msk.msra.mxu3 %vm192_vm8, %v190_v61 }
 0x1a6   :  { %357 = vmatpush.msk.msra.mxu1 %vm192_vm8, %v189_v62  ;;  %374 = vmatpush.msk.msra.mxu3 %vm192_vm8, %v189_v62 }
 0x1a7   :  { %v248_v17 = vpop.permute.xlu0 %247 }
 0x1a8   :  { %v177_v1 = vpop.permute.xlu1 %176 }
 0x1a9   :  { %v188_v2 = vsel %vm186_vm7, %v165_v52, %v177_v1 }
 0x1aa   :  { %358 = vmatpush.msk.msra.mxu1 %vm192_vm8, %v188_v2  ;;  %375 = vmatpush.msk.msra.mxu3 %vm192_vm8, %v188_v2 }
 0x1ac   :  { %359 = vmatpush.msk.msra.mxu1 %vm192_vm8, %v187_v6  ;;  %376 = vmatpush.msk.msra.mxu3 %vm192_vm8, %v187_v6 }
 0x1ad   :  { %360 = vmatmul.msk.f32.vlgmr.msra.gmra.mxu1 %vm260_vm9, %v150_v4  ;;  %362 = vmatmul.msk.f32.vlgmr.msra.gmra.mxu3 %vm260_vm9, %v152_v5 }
 0x1b0   :  { %v258_v11 = vpop.permute.xlu1 %257 }
 0x1b5   :  { %361 = vmatmul.msk.f32.gmra.mxu1 %vm260_vm9, %v151_v7  ;;  %363 = vmatmul.msk.f32.gmra.mxu3 %vm260_vm9, %v153_v8 }
 0x1b8   :  { %v243_v20 = vpop.permute.xlu1 %242 }
 0x22a   :  { %v290_v9 = vpop.f32.mrf.mxu1 }
 0x22b   :  { %v291_v21 = vadd.f32 %v290_v9, %v243_v20 }
 0x22d   :  { %v302_v24 = vmax.f32 %v291_v21, 0.0 }
 0x230   :  { %v296_v10 = vpop.f32.mrf.mxu3 }
 0x231   :  { %v297_v15 = vadd.f32 %v296_v10, %v253_v12 }
 0x232   :  { %v293_v13 = vpop.f32.mrf.mxu1 }
 0x233   :  { %v294_v18 = vadd.f32 %v293_v13, %v248_v17  ;;  %v304_v22 = vmax.f32 %v297_v15, 0.0 }
 0x235   :  { %v303_v23 = vmax.f32 %v294_v18, 0.0 }
 0x238   :  { %v299_v14 = vpop.f32.mrf.mxu3 }
 0x239   :  { %v300_v16 = vadd.f32 %v299_v14, %v258_v11 }
 0x23b   :  { %v305_v19 = vmax.f32 %v300_v16, 0.0 }
 0x23d   :  { %329 = vmatpush.msra.mxu2 %v305_v19 }
 0x23f   :  { %330 = vmatpush.msra.mxu2 %v304_v22 }
 0x241   :  { %331 = vmatpush.msra.mxu2 %v303_v23 }
 0x243   :  { %332 = vmatpush.msra.mxu2 %v302_v24 }
 0x244   :  { %364 = vmatmul.msk.f32.vlgmr.msra.gmra.mxu2 %vm313_vm10, %v306_v25 }
 0x2c7   :  { %v334_v27 = vpop.f32.mrf.mxu2 }
 0x2c8   :  { %v335_v29 = vadd.f32 %v334_v27, %v311_v26 }
 0x2ca   :  { %v339_v30 = vmul.f32 %v338_v28, %v335_v29 }
 0x2cc   :  { %v340_v31 = vadd.f32 %v339_v30, %v446_v0 }
 0x2ce   :  { %341 = vst.msk [vmem:[%s564_s8] sm:$0xff] %vm313_vm10, %v340_v31 }

</bundles_post_ra>
